<compile_context>
chip_gen: v7x
topology: tpu7x:2x2x1
jax: 0.10.0
libtpu: 0.0.40
codegen_flags: <defaults>
</compile_context>

<pallas_src>
import functools

import jax
import jax.numpy as jnp
from jax import lax
from jax.experimental import pallas as pl
from jax.experimental.pallas import tpu as pltpu

KSIZE = 4
EPS = 1e-5
NEG_SLOPE = 0.2


def _round_up(x, m):
    return (x + m - 1) // m * m


def _conv_taps(xs_ref, xsn_ref, w_ref, win_ref, acc_ref, shifts):
    """4 shifted bf16 matmuls of the space-to-depth'd 4x4/stride-2 conv,
    accumulated in-place into a f32 VMEM scratch (MRB-friendly on v7x)."""
    tp = acc_ref.shape[-1]
    # Assemble the lane window [p*TP, p*TP + TP + EXT) with two aligned stores.
    win_ref[:, :tp] = xs_ref[...]
    win_ref[:, tp:] = xsn_ref[...]
    # NOTE(perf review): the shifted slices below have unaligned lane starts
    # (1, ws, ws+1); pre-materialising shifted copies on the host would trade
    # ~2x input HBM bytes for less in-kernel lane movement and is only
    # worthwhile if a bundle dump shows the XLU/copy slots saturating.
    acc_ref[...] = jnp.dot(w_ref[0], win_ref[:, pl.ds(shifts[0], tp)],
                           preferred_element_type=jnp.float32)
    for t in range(1, 4):
        acc_ref[...] += jnp.dot(w_ref[t], win_ref[:, pl.ds(shifts[t], tp)],
                                preferred_element_type=jnp.float32)


def _fused_kernel(xs_ref, xsn_ref, w_ref, mask_ref, out_ref, win_ref, acc_ref,
                  *, shifts, inv_p):
    """Single-spatial-tile path: conv + InstanceNorm + LeakyReLU in one step."""
    _conv_taps(xs_ref, xsn_ref, w_ref, win_ref, acc_ref, shifts)
    acc = acc_ref[...]
    mask = mask_ref[...]
    mean = jnp.sum(acc * mask, axis=1, keepdims=True) * inv_p
    diff = (acc - mean) * mask                      # two-pass variance here
    var = jnp.sum(diff * diff, axis=1, keepdims=True) * inv_p
    y = (acc - mean) * lax.rsqrt(var + EPS)
    out_ref[...] = jnp.where(y >= 0.0, y, NEG_SLOPE * y).astype(out_ref.dtype)


def _conv_stats_kernel(xs_ref, xsn_ref, w_ref, mask_ref,
                       pre_ref, mean_ref, rstd_ref,
                       win_ref, acc_ref, ssum_ref, ssq_ref,
                       *, shifts, inv_p):
    """P-tiled sweep 1: conv -> bf16 pre-norm activation + per-channel stats."""
    p = pl.program_id(2)
    _conv_taps(xs_ref, xsn_ref, w_ref, win_ref, acc_ref, shifts)
    acc = acc_ref[...]
    pre_ref[...] = acc.astype(pre_ref.dtype)

    @pl.when(p == 0)
    def _():
        ssum_ref[...] = jnp.zeros_like(ssum_ref)
        ssq_ref[...] = jnp.zeros_like(ssq_ref)

    mask = mask_ref[...]
    acc_m = acc * mask
    ssum_ref[...] += jnp.sum(acc_m, axis=1, keepdims=True)
    ssq_ref[...] += jnp.sum(acc_m * acc, axis=1, keepdims=True)

    @pl.when(p == pl.num_programs(2) - 1)
    def _():
        mean = ssum_ref[...] * inv_p
        # TODO(synk): E[x^2]-E[x]^2 can cancel for activations with a huge DC
        # offset; a true two-pass variance would need a third sweep over xs.
        var = jnp.maximum(ssq_ref[...] * inv_p - mean * mean, 0.0)
        rstd = lax.rsqrt(var + EPS)
        mean_ref[...] = jnp.broadcast_to(mean, mean_ref.shape)
        rstd_ref[...] = jnp.broadcast_to(rstd, rstd_ref.shape)


def _norm_act_kernel(pre_ref, mean_ref, rstd_ref, out_ref):
    """P-tiled sweep 2: (x - mean) * rstd -> LeakyReLU(0.2), bf16 in/out."""
    x = pre_ref[...].astype(jnp.float32)
    y = (x - mean_ref[:, 0:1]) * rstd_ref[:, 0:1]
    out_ref[...] = jnp.where(y >= 0.0, y, NEG_SLOPE * y).astype(out_ref.dtype)


@functools.partial(jax.jit, static_argnames=("stride", "max_tile_lanes"))
def cnn_block_forward(x, weight, stride=2, max_tile_lanes=None):
    """x: (N, C_in, H, W) NCHW, weight: (C_out, C_in, 4, 4) -> (N, C_out, Ho, Wo)."""
    if stride != 2:
        # TODO(synk): only the stride=2 path (the module default, used by every
        # InstanceNorm'd pix2pix block) maps onto the space-to-depth
        # factorization; stride=1 would need a different decomposition.
        raise NotImplementedError("cnn_block_forward supports stride=2 only")
    n, c_in, h, w = x.shape
    c_out = weight.shape[0]
    assert h % 2 == 0 and w % 2 == 0 and h >= KSIZE and w >= KSIZE

    hs, ws = h // 2, w // 2
    ho, wo = hs - 1, ws - 1                       # conv output spatial dims
    p_flat = hs * ws                              # flattened (Hs, Ws) spatial
    c4 = 4 * c_in
    c4p = _round_up(c4, 16)                       # bf16 sublane tile
    c_out_p = _round_up(c_out, 16) if c_out <= 128 else _round_up(c_out, 128)
    tco = min(c_out_p, 128)
    n_co = c_out_p // tco

    # --- generation-aware VMEM budget ---
    try:
        vmem_cap = pltpu.get_tpu_info().vmem_capacity_bytes
    except Exception:                             # conservative fallback
        vmem_cap = 64 << 20
    vmem_limit = (40 << 20) if vmem_cap <= (64 << 20) else (100 << 20)
    usable = int(vmem_limit * 0.7)

    # --- spatial (P) tile size from the VMEM budget ---
    ext = 128 * ((ws + 1 + 127) // 128)           # lane spill window (>= ws+1)
    per_lane = 6 * c4p + 8 * tco + 8              # VMEM bytes per output lane
    fixed = 6 * c4p * ext + 16 * tco * c4p + 2048 * tco + (64 << 10)
    tp_cap = max(ext, ((usable - fixed) // per_lane) // ext * ext)
    target = 4096 if max_tile_lanes is None else max_tile_lanes
    tp_target = max(ext, (target // ext) * ext)
    p_need = _round_up(p_flat, ext)
    tp = min(tp_cap, tp_target, p_need)           # multiple of ext
    n_p = -(-p_flat // tp)
    pp_total = n_p * tp
    lanes_in = pp_total + ext

    # --- space-to-depth (single fused transpose+pad pass) ---
    # x[c, 2i+di, 2j+dj] -> xs[(di*2+dj)*C_in + c, i*ws + j]
    xs = x.reshape(n, c_in, hs, 2, ws, 2).transpose(0, 3, 5, 1, 2, 4)
    xs = xs.reshape(n, c4, p_flat).astype(jnp.bfloat16)
    xs_pad = jnp.pad(xs, ((0, 0), (0, c4p - c4), (0, lanes_in - p_flat)))
    # TODO(synk): the space-to-depth could be done fully in-kernel with
    # stride-2 manual DMAs (memory_space=pl.ANY) to drop this XLA pass too.

    # --- weights: w[co, c, 2a+di, 2b+dj] -> w4[2a+b, co, (2di+dj)*C_in + c] ---
    w6 = weight.reshape(c_out, c_in, 2, 2, 2, 2)
    w4 = w6.transpose(2, 4, 0, 3, 5, 1).reshape(4, c_out, c4).astype(jnp.bfloat16)
    w4_pad = jnp.pad(w4, ((0, 0), (0, c_out_p - c_out), (0, c4p - c4)))

    # --- validity mask over the flattened, lane-padded spatial axis ---
    q = jnp.arange(pp_total, dtype=jnp.int32)
    valid = (q < p_flat) & ((q % ws) < wo) & ((q // ws) < ho)
    mask = valid.astype(jnp.float32)[None, :]

    shifts = (0, 1, ws, ws + 1)                   # tap index = 2a + b
    inv_p = 1.0 / float(ho * wo)

    # --- grid order: keep the larger operand resident across the other axis ---
    co_outer = 4 * c_out_p * c4p > c4p * lanes_in
    if co_outer:
        grid2 = (n_co, n)
        b_of = lambda g0, g1: g1
        j_of = lambda g0, g1: g0
    else:
        grid2 = (n, n_co)
        b_of = lambda g0, g1: g0
        j_of = lambda g0, g1: g1

    xs_spec = pl.BlockSpec((pl.Squeezed(), c4p, tp),
                           lambda g0, g1, p: (b_of(g0, g1), 0, p))
    xsn_spec = pl.BlockSpec((pl.Squeezed(), c4p, ext),
                            lambda g0, g1, p: (b_of(g0, g1), 0,
                                               (p + 1) * (tp // ext)))
    w_spec = pl.BlockSpec((4, tco, c4p), lambda g0, g1, p: (0, j_of(g0, g1), 0))
    mask_spec = pl.BlockSpec((1, tp), lambda g0, g1, p: (0, p))
    act_spec = pl.BlockSpec((pl.Squeezed(), tco, tp),
                            lambda g0, g1, p: (b_of(g0, g1), j_of(g0, g1), p))
    stats_spec = pl.BlockSpec((pl.Squeezed(), tco, 128),
                              lambda g0, g1, p: (b_of(g0, g1), j_of(g0, g1), 0))

    common_scratch = [pltpu.VMEM((c4p, tp + ext), jnp.bfloat16),  # lane window
                      pltpu.VMEM((tco, tp), jnp.float32)]         # f32 acc

    flops = 2 * n * c_out_p * (4 * c4p) * pp_total
    bytes_accessed = (n_co * n * c4p * lanes_in * 2 + 4 * c_out_p * c4p * 2
                      + n * c_out_p * pp_total * 2)

    if n_p == 1:
        # Whole spatial plane fits: fully fused conv + InstanceNorm + LeakyReLU.
        out = pl.pallas_call(
            functools.partial(_fused_kernel, shifts=shifts, inv_p=inv_p),
            out_shape=jax.ShapeDtypeStruct((n, c_out_p, pp_total), jnp.bfloat16),
            grid_spec=pltpu.PrefetchScalarGridSpec(
                num_scalar_prefetch=0,
                grid=grid2 + (n_p,),
                in_specs=[xs_spec, xsn_spec, w_spec, mask_spec],
                out_specs=act_spec,
                scratch_shapes=common_scratch),
            compiler_params=pltpu.CompilerParams(
                dimension_semantics=("parallel", "parallel", "arbitrary"),
                vmem_limit_bytes=vmem_limit),
            cost_estimate=pl.CostEstimate(flops=flops,
                                          transcendentals=n * c_out_p,
                                          bytes_accessed=bytes_accessed),
        )(xs_pad, xs_pad, w4_pad, mask)
    else:
        # Large feature maps: P-tiled sweep 1 (conv + per-channel stats) ...
        pre, mean, rstd = pl.pallas_call(
            functools.partial(_conv_stats_kernel, shifts=shifts, inv_p=inv_p),
            out_shape=(jax.ShapeDtypeStruct((n, c_out_p, pp_total), jnp.bfloat16),
                       jax.ShapeDtypeStruct((n, c_out_p, 128), jnp.float32),
                       jax.ShapeDtypeStruct((n, c_out_p, 128), jnp.float32)),
            grid_spec=pltpu.PrefetchScalarGridSpec(
                num_scalar_prefetch=0,
                grid=grid2 + (n_p,),
                in_specs=[xs_spec, xsn_spec, w_spec, mask_spec],
                out_specs=(act_spec, stats_spec, stats_spec),
                scratch_shapes=common_scratch
                + [pltpu.VMEM((tco, 1), jnp.float32),
                   pltpu.VMEM((tco, 1), jnp.float32)]),
            compiler_params=pltpu.CompilerParams(
                dimension_semantics=("parallel", "parallel", "arbitrary"),
                vmem_limit_bytes=vmem_limit),
            cost_estimate=pl.CostEstimate(flops=flops,
                                          transcendentals=n * c_out_p,
                                          bytes_accessed=bytes_accessed),
        )(xs_pad, xs_pad, w4_pad, mask)

        # ... then a lightweight elementwise sweep 2 (normalize + LeakyReLU).
        out = pl.pallas_call(
            _norm_act_kernel,
            out_shape=jax.ShapeDtypeStruct((n, c_out_p, pp_total), jnp.bfloat16),
            grid_spec=pltpu.PrefetchScalarGridSpec(
                num_scalar_prefetch=0,
                grid=(n, n_co, n_p),
                in_specs=[pl.BlockSpec((pl.Squeezed(), tco, tp),
                                       lambda b, j, p: (b, j, p)),
                          pl.BlockSpec((pl.Squeezed(), tco, 128),
                                       lambda b, j, p: (b, j, 0)),
                          pl.BlockSpec((pl.Squeezed(), tco, 128),
                                       lambda b, j, p: (b, j, 0))],
                out_specs=pl.BlockSpec((pl.Squeezed(), tco, tp),
                                       lambda b, j, p: (b, j, p))),
            compiler_params=pltpu.CompilerParams(
                dimension_semantics=("parallel", "parallel", "parallel"),
                vmem_limit_bytes=vmem_limit),
        )(pre, mean, rstd)

    # bf16, already channel-major: un-flatten spatial, crop, cast to x.dtype.
    y = out[:, :c_out, :p_flat].reshape(n, c_out, hs, ws)[:, :, :ho, :wo]
    return y.astype(x.dtype)


def _reference(x, weight, stride=2):
    """Pure-JAX reference with PyTorch semantics.  Conv operands are rounded
    to bf16 to match the kernel's intentional MXU operand precision (the
    kernel output is also bf16, which is covered by the test tolerances)."""
    xb = x.astype(jnp.bfloat16).astype(jnp.float32)
    wb = weight.astype(jnp.bfloat16).astype(jnp.float32)
    y = lax.conv_general_dilated(
        xb, wb, window_strides=(stride, stride), padding="VALID",
        dimension_numbers=("NCHW", "OIHW", "NCHW"))
    mean = jnp.mean(y, axis=(2, 3), keepdims=True)
    var = jnp.mean((y - mean) ** 2, axis=(2, 3), keepdims=True)
    y = (y - mean) * lax.rsqrt(var + EPS)
    return jnp.where(y >= 0, y, NEG_SLOPE * y)


if __name__ == "__main__":
    key = jax.random.PRNGKey(0)
    kx, kw, kx2, kw2 = jax.random.split(key, 4)

    # Small shape -> single-tile fused path.
    N, C_IN, C_OUT, H, W = 2, 4, 8, 16, 16
    x = jax.random.normal(kx, (N, C_IN, H, W), dtype=jnp.float32)
    weight = 0.05 * jax.random.normal(kw, (C_OUT, C_IN, KSIZE, KSIZE),
                                      dtype=jnp.float32)
    out = cnn_block_forward(x, weight)
    jax.block_until_ready(out)
    ref = _reference(x, weight)
    assert out.shape == ref.shape == (N, C_OUT, (H - KSIZE) // 2 + 1,
                                      (W - KSIZE) // 2 + 1)
    assert jnp.allclose(out, ref, rtol=2e-2, atol=2e-2), (
        "fused path mismatch vs JAX reference, max abs err = "
        f"{float(jnp.max(jnp.abs(out - ref)))}")

    # Slightly larger shape with a forced small spatial tile to exercise the
    # P-tiled (conv+stats, then normalize) two-kernel path at small cost.
    x2 = jax.random.normal(kx2, (1, C_IN, 32, 32), dtype=jnp.float32)
    w2 = 0.05 * jax.random.normal(kw2, (C_OUT, C_IN, KSIZE, KSIZE),
                                  dtype=jnp.float32)
    out2 = cnn_block_forward(x2, w2, max_tile_lanes=128)
    jax.block_until_ready(out2)
    ref2 = _reference(x2, w2)
    assert out2.shape == ref2.shape
    assert jnp.allclose(out2, ref2, rtol=2e-2, atol=2e-2), (
        "tiled path mismatch vs JAX reference, max abs err = "
        f"{float(jnp.max(jnp.abs(out2 - ref2)))}")

    print("KERNEL_OK")
</pallas_src>

<mosaic_0001>
module attributes {stable_mosaic.version = 11 : i64} {
  func.func @_fused_kernel(%arg0: i32, %arg1: i32, %arg2: i32, %arg3: memref<1x16x128xbf16, #tpu.memory_space<vmem>>, %arg4: memref<1x16x128xbf16, #tpu.memory_space<vmem>>, %arg5: memref<4x16x16xbf16, #tpu.memory_space<vmem>>, %arg6: memref<1x128xf32, #tpu.memory_space<vmem>>, %arg7: memref<1x16x128xbf16, #tpu.memory_space<vmem>>, %arg8: memref<16x256xbf16, #tpu.memory_space<vmem>>, %arg9: memref<16x128xf32, #tpu.memory_space<vmem>>) attributes {dimension_semantics = [#tpu.dimension_semantics<parallel>, #tpu.dimension_semantics<parallel>, #tpu.dimension_semantics<arbitrary>], iteration_bounds = array<i64: 2, 1, 1>, scalar_prefetch = 0 : i64, scratch_operands = 2 : i64, tpu.core_type = #tpu.core_type<tc>, window_params = [{transform_indices = @transform_0, window_bounds = array<i64: 1, 16, 128>}, {transform_indices = @transform_1, window_bounds = array<i64: 1, 16, 128>}, {transform_indices = @transform_2, window_bounds = array<i64: 4, 16, 16>}, {transform_indices = @transform_3, window_bounds = array<i64: 1, 128>}, {transform_indices = @transform_4, window_bounds = array<i64: 1, 16, 128>}]} {
    %c0 = arith.constant 0 : index
    %c0_0 = arith.constant 0 : index
    %c0_1 = arith.constant 0 : index
    %0 = vector.load %arg3[%c0, %c0_0, %c0_1] : memref<1x16x128xbf16, #tpu.memory_space<vmem>>, vector<1x16x128xbf16>
    %1 = vector.shape_cast %0 : vector<1x16x128xbf16> to vector<16x128xbf16>
    %c0_2 = arith.constant 0 : index
    %c0_3 = arith.constant 0 : index
    %2 = vector.load %arg8[%c0_2, %c0_3] : memref<16x256xbf16, #tpu.memory_space<vmem>>, vector<16x128xbf16>
    tpu.vector_store %arg8[%c0_2, %c0_3], %1 {strides = array<i32>} : memref<16x256xbf16, #tpu.memory_space<vmem>>, vector<16x128xbf16>,
    %c0_4 = arith.constant 0 : index
    %c0_5 = arith.constant 0 : index
    %c0_6 = arith.constant 0 : index
    %3 = vector.load %arg4[%c0_4, %c0_5, %c0_6] : memref<1x16x128xbf16, #tpu.memory_space<vmem>>, vector<1x16x128xbf16>
    %4 = vector.shape_cast %3 : vector<1x16x128xbf16> to vector<16x128xbf16>
    %c0_7 = arith.constant 0 : index
    %c128 = arith.constant 128 : index
    %5 = vector.load %arg8[%c0_7, %c128] : memref<16x256xbf16, #tpu.memory_space<vmem>>, vector<16x128xbf16>
    tpu.vector_store %arg8[%c0_7, %c128], %4 {strides = array<i32>} : memref<16x256xbf16, #tpu.memory_space<vmem>>, vector<16x128xbf16>,
    %c0_8 = arith.constant 0 : index
    %c0_9 = arith.constant 0 : index
    %c0_10 = arith.constant 0 : index
    %6 = vector.load %arg5[%c0_8, %c0_9, %c0_10] : memref<4x16x16xbf16, #tpu.memory_space<vmem>>, vector<1x16x16xbf16>
    %7 = vector.shape_cast %6 : vector<1x16x16xbf16> to vector<16x16xbf16>
    %c0_11 = arith.constant 0 : index
    %c0_12 = arith.constant 0 : index
    %8 = vector.load %arg8[%c0_11, %c0_12] : memref<16x256xbf16, #tpu.memory_space<vmem>>, vector<16x128xbf16>
    %cst = arith.constant dense<0.000000e+00> : vector<16x128xf32>
    %9 = tpu.matmul %7, %8, %cst {dimension_numbers = #tpu.dot_dimension_numbers<[1], [0], [0], [1], [0, 0, 1, 1], [], []>} : vector<16x16xbf16>, vector<16x128xbf16>, vector<16x128xf32> -> vector<16x128xf32>
    %c0_13 = arith.constant 0 : index
    %c0_14 = arith.constant 0 : index
    %10 = vector.load %arg9[%c0_13, %c0_14] : memref<16x128xf32, #tpu.memory_space<vmem>>, vector<16x128xf32>
    tpu.vector_store %arg9[%c0_13, %c0_14], %9 {strides = array<i32>} : memref<16x128xf32, #tpu.memory_space<vmem>>, vector<16x128xf32>,
    %c0_15 = arith.constant 0 : index
    %c0_16 = arith.constant 0 : index
    %11 = vector.load %arg9[%c0_15, %c0_16] : memref<16x128xf32, #tpu.memory_space<vmem>>, vector<16x128xf32>
    %c1 = arith.constant 1 : index
    %c0_17 = arith.constant 0 : index
    %c0_18 = arith.constant 0 : index
    %12 = vector.load %arg5[%c1, %c0_17, %c0_18] : memref<4x16x16xbf16, #tpu.memory_space<vmem>>, vector<1x16x16xbf16>
    %13 = vector.shape_cast %12 : vector<1x16x16xbf16> to vector<16x16xbf16>
    %c0_19 = arith.constant 0 : index
    %c1_20 = arith.constant 1 : index
    %14 = vector.load %arg8[%c0_19, %c1_20] : memref<16x256xbf16, #tpu.memory_space<vmem>>, vector<16x128xbf16>
    %cst_21 = arith.constant dense<0.000000e+00> : vector<16x128xf32>
    %15 = tpu.matmul %13, %14, %cst_21 {dimension_numbers = #tpu.dot_dimension_numbers<[1], [0], [0], [1], [0, 0, 1, 1], [], []>} : vector<16x16xbf16>, vector<16x128xbf16>, vector<16x128xf32> -> vector<16x128xf32>
    %16 = arith.addf %11, %15 : vector<16x128xf32>
    %c0_22 = arith.constant 0 : index
    %c0_23 = arith.constant 0 : index
    %17 = vector.load %arg9[%c0_22, %c0_23] : memref<16x128xf32, #tpu.memory_space<vmem>>, vector<16x128xf32>
    tpu.vector_store %arg9[%c0_22, %c0_23], %16 {strides = array<i32>} : memref<16x128xf32, #tpu.memory_space<vmem>>, vector<16x128xf32>,
    %c0_24 = arith.constant 0 : index
    %c0_25 = arith.constant 0 : index
    %18 = vector.load %arg9[%c0_24, %c0_25] : memref<16x128xf32, #tpu.memory_space<vmem>>, vector<16x128xf32>
    %c2 = arith.constant 2 : index
    %c0_26 = arith.constant 0 : index
    %c0_27 = arith.constant 0 : index
    %19 = vector.load %arg5[%c2, %c0_26, %c0_27] : memref<4x16x16xbf16, #tpu.memory_space<vmem>>, vector<1x16x16xbf16>
    %20 = vector.shape_cast %19 : vector<1x16x16xbf16> to vector<16x16xbf16>
    %c0_28 = arith.constant 0 : index
    %c8 = arith.constant 8 : index
    %21 = vector.load %arg8[%c0_28, %c8] : memref<16x256xbf16, #tpu.memory_space<vmem>>, vector<16x128xbf16>
    %cst_29 = arith.constant dense<0.000000e+00> : vector<16x128xf32>
    %22 = tpu.matmul %20, %21, %cst_29 {dimension_numbers = #tpu.dot_dimension_numbers<[1], [0], [0], [1], [0, 0, 1, 1], [], []>} : vector<16x16xbf16>, vector<16x128xbf16>, vector<16x128xf32> -> vector<16x128xf32>
    %23 = arith.addf %18, %22 : vector<16x128xf32>
    %c0_30 = arith.constant 0 : index
    %c0_31 = arith.constant 0 : index
    %24 = vector.load %arg9[%c0_30, %c0_31] : memref<16x128xf32, #tpu.memory_space<vmem>>, vector<16x128xf32>
    tpu.vector_store %arg9[%c0_30, %c0_31], %23 {strides = array<i32>} : memref<16x128xf32, #tpu.memory_space<vmem>>, vector<16x128xf32>,
    %c0_32 = arith.constant 0 : index
    %c0_33 = arith.constant 0 : index
    %25 = vector.load %arg9[%c0_32, %c0_33] : memref<16x128xf32, #tpu.memory_space<vmem>>, vector<16x128xf32>
    %c3 = arith.constant 3 : index
    %c0_34 = arith.constant 0 : index
    %c0_35 = arith.constant 0 : index
    %26 = vector.load %arg5[%c3, %c0_34, %c0_35] : memref<4x16x16xbf16, #tpu.memory_space<vmem>>, vector<1x16x16xbf16>
    %27 = vector.shape_cast %26 : vector<1x16x16xbf16> to vector<16x16xbf16>
    %c0_36 = arith.constant 0 : index
    %c9 = arith.constant 9 : index
    %28 = vector.load %arg8[%c0_36, %c9] : memref<16x256xbf16, #tpu.memory_space<vmem>>, vector<16x128xbf16>
    %cst_37 = arith.constant dense<0.000000e+00> : vector<16x128xf32>
    %29 = tpu.matmul %27, %28, %cst_37 {dimension_numbers = #tpu.dot_dimension_numbers<[1], [0], [0], [1], [0, 0, 1, 1], [], []>} : vector<16x16xbf16>, vector<16x128xbf16>, vector<16x128xf32> -> vector<16x128xf32>
    %30 = arith.addf %25, %29 : vector<16x128xf32>
    %c0_38 = arith.constant 0 : index
    %c0_39 = arith.constant 0 : index
    %31 = vector.load %arg9[%c0_38, %c0_39] : memref<16x128xf32, #tpu.memory_space<vmem>>, vector<16x128xf32>
    tpu.vector_store %arg9[%c0_38, %c0_39], %30 {strides = array<i32>} : memref<16x128xf32, #tpu.memory_space<vmem>>, vector<16x128xf32>,
    %c0_40 = arith.constant 0 : index
    %c0_41 = arith.constant 0 : index
    %32 = vector.load %arg9[%c0_40, %c0_41] : memref<16x128xf32, #tpu.memory_space<vmem>>, vector<16x128xf32>
    %c0_42 = arith.constant 0 : index
    %c0_43 = arith.constant 0 : index
    %33 = vector.load %arg6[%c0_42, %c0_43] : memref<1x128xf32, #tpu.memory_space<vmem>>, vector<1x128xf32>
    %34 = vector.broadcast %33 : vector<1x128xf32> to vector<16x128xf32>
    %35 = arith.mulf %32, %34 : vector<16x128xf32>
    %cst_44 = arith.constant dense<0.000000e+00> : vector<16xf32>
    %36 = vector.multi_reduction <add>, %35, %cst_44 [1] : vector<16x128xf32> to vector<16xf32>
    %37 = vector.shape_cast %36 : vector<16xf32> to vector<16x1xf32>
    %cst_45 = arith.constant 0.0204081628 : f32
    %38 = vector.broadcast %cst_45 : f32 to vector<16x1xf32>
    %39 = arith.mulf %37, %38 : vector<16x1xf32>
    %40 = vector.broadcast %39 : vector<16x1xf32> to vector<16x128xf32>
    %41 = arith.subf %32, %40 : vector<16x128xf32>
    %42 = vector.broadcast %33 : vector<1x128xf32> to vector<16x128xf32>
    %43 = arith.mulf %41, %42 : vector<16x128xf32>
    %44 = arith.mulf %43, %43 : vector<16x128xf32>
    %cst_46 = arith.constant dense<0.000000e+00> : vector<16xf32>
    %45 = vector.multi_reduction <add>, %44, %cst_46 [1] : vector<16x128xf32> to vector<16xf32>
    %46 = vector.shape_cast %45 : vector<16xf32> to vector<16x1xf32>
    %cst_47 = arith.constant 0.0204081628 : f32
    %47 = vector.broadcast %cst_47 : f32 to vector<16x1xf32>
    %48 = arith.mulf %46, %47 : vector<16x1xf32>
    %49 = vector.broadcast %39 : vector<16x1xf32> to vector<16x128xf32>
    %50 = arith.subf %32, %49 : vector<16x128xf32>
    %cst_48 = arith.constant 9.99999974E-6 : f32
    %51 = vector.broadcast %cst_48 : f32 to vector<16x1xf32>
    %52 = arith.addf %48, %51 : vector<16x1xf32>
    %53 = math.rsqrt %52 : vector<16x1xf32>
    %54 = vector.broadcast %53 : vector<16x1xf32> to vector<16x128xf32>
    %55 = arith.mulf %50, %54 : vector<16x128xf32>
    %cst_49 = arith.constant 0.000000e+00 : f32
    %56 = vector.broadcast %cst_49 : f32 to vector<16x128xf32>
    %57 = arith.cmpf oge, %55, %56 : vector<16x128xf32>
    %cst_50 = arith.constant 2.000000e-01 : f32
    %58 = vector.broadcast %cst_50 : f32 to vector<16x128xf32>
    %59 = arith.mulf %58, %55 : vector<16x128xf32>
    %60 = arith.select %57, %55, %59 : vector<16x128xi1>, vector<16x128xf32>
    %61 = arith.truncf %60 : vector<16x128xf32> to vector<16x128xbf16>
    %c0_51 = arith.constant 0 : index
    %c0_52 = arith.constant 0 : index
    %c0_53 = arith.constant 0 : index
    %62 = vector.load %arg7[%c0_51, %c0_52, %c0_53] : memref<1x16x128xbf16, #tpu.memory_space<vmem>>, vector<1x16x128xbf16>
    %63 = vector.shape_cast %62 : vector<1x16x128xbf16> to vector<16x128xbf16>
    %64 = vector.shape_cast %61 : vector<16x128xbf16> to vector<1x16x128xbf16>
    tpu.vector_store %arg7[%c0_51, %c0_52, %c0_53], %64 {strides = array<i32>} : memref<1x16x128xbf16, #tpu.memory_space<vmem>>, vector<1x16x128xbf16>,
    return
  }
  func.func @transform_0(%arg0: i32, %arg1: i32, %arg2: i32) -> (i32, i32, i32) {
    %c0_i32 = arith.constant 0 : i32
    %c0_i32_0 = arith.constant 0 : i32
    return %arg0, %c0_i32, %arg2 : i32, i32, i32
  }
  func.func @transform_1(%arg0: i32, %arg1: i32, %arg2: i32) -> (i32, i32, i32) {
    %c1_i32 = arith.constant 1 : i32
    %0 = arith.addi %arg2, %c1_i32 : i32
    %c1_i32_0 = arith.constant 1 : i32
    %1 = arith.muli %0, %c1_i32_0 : i32
    %c0_i32 = arith.constant 0 : i32
    %c0_i32_1 = arith.constant 0 : i32
    return %arg0, %c0_i32, %1 : i32, i32, i32
  }
  func.func @transform_2(%arg0: i32, %arg1: i32, %arg2: i32) -> (i32, i32, i32) {
    %c0_i32 = arith.constant 0 : i32
    %c0_i32_0 = arith.constant 0 : i32
    %c0_i32_1 = arith.constant 0 : i32
    return %c0_i32, %arg1, %c0_i32_0 : i32, i32, i32
  }
  func.func @transform_3(%arg0: i32, %arg1: i32, %arg2: i32) -> (i32, i32) {
    %c0_i32 = arith.constant 0 : i32
    %c0_i32_0 = arith.constant 0 : i32
    return %c0_i32, %arg2 : i32, i32
  }
  func.func @transform_4(%arg0: i32, %arg1: i32, %arg2: i32) -> (i32, i32, i32) {
    %c0_i32 = arith.constant 0 : i32
    return %arg0, %arg1, %arg2 : i32, i32, i32
  }
}

</mosaic_0001>

<bundles_post_ra>
// kernel: cnn_block_forward.1
= control target key start
LH: loop header
LB: loop body
LE: loop exit
PB: predicated region body
PF: predicated region fallthrough
CT: control target
= control target key end

     0   :  { %s1093_s15 = smov 0   ;;  %s1095_s16 = smov 0   ;;  %s1195_s0 = inlined_call_operand.vmem [shape: bf16[2,16,256], index: 0, kind: input, shape index: {}, may-alias: {0,1}]   ;;  %s1196_s1 = inlined_call_operand.vmem [shape: bf16[2,16,256], index: 1, kind: input, shape index: {}, may-alias: {0,1}]   ;;  %s1197_s2 = inlined_call_operand.vmem [shape: bf16[4,16,16], index: 2, kind: input, shape index: {}]   ;;  %s1198_s3 = inlined_call_operand.vmem [shape: f32[1,128], index: 3, kind: input, shape index: {}]   ;;  %s1199_s4 = inlined_call_operand.vmem [shape: bf16[2,16,128], index: 4, kind: output, shape index: {}]  }
   0x1   :  { %s1097_s17 = smov 0   ;;  %s1099_s18 = smov 0  }
   0x2   :  { %s1101_s19 = smov 0  }
   0x3 LB: > { %s33_s20 = sadd.s32 1, %s1057_s18  ;;  %p49_p1 = scmp.ne.s32.totalorder %s1049_s16, %s1045_s15  ;;  %s1061_s19 = sphi %s1101_s19, %s14_s19   ;;  %s1057_s18 = sphi %s1099_s18, %s1204_s18   ;;  %s1053_s17 = sphi %s1097_s17, %s1203_s17   ;;  %s1049_s16 = sphi %s1095_s16, %s1202_s16   ;;  %s1045_s15 = sphi %s1093_s15, %s1201_s15  }
   0x4   : > { %p35_p0 = scmp.ge.s32.totalorder %s33_s20, 2  ;;  %p50_p2 = scmp.eq.s32.totalorder %s1061_s19, 0 }
   0x5   : > { %s42_s23 = sadd.s32 1, %s1049_s16  ;;  %p881_p5 = scmp.ge.s32.totalorder %s1061_s19, 2 }
   0x6   : > { %s1206_s20 = smov (%p35_p0, %s33_s20), 0  ;;  %p1124_p3 = por %p50_p2, %p49_p1 }
   0x7   : > { %s37_s22 = ssub.s32 %s1057_s18, %s1206_s20  ;;  %202 = sbr.rel (%p881_p5) target bundleno = 28 (0x1c), region = 24 }
   0x8   : > { %p40_p4 = scmp.eq.s32.totalorder %s37_s22, 0 }
   0xa   : > { %s1132_s24 = scalar_select %p40_p4, %s1049_s16, %s42_s23  }
   0xe   : > { %205 = sbr.rel (!%p1124_p3) target bundleno = 21 (0x15), region = 28  ;;  %s207_s25 = sand.u32 (%p1124_p3), 1, %s1049_s16  }
   0xf   : > { %s916_s26 = sshll.u32 (%p1124_p3), %s1057_s18, 4  ;;  %s882_s27 = sshll.u32 (%p1124_p3), %s207_s25, 3 }
  0x10   : > { %s213_s30 = scalar_lea.vmem (%p1124_p3), %s1195_s0, %s916_s26  ;;  %s209_s5 = scalar_lea.vmem (%p1124_p3), [#allocation4], %s882_s27 }
  0x11   : > { %v229_v0 = vld [vmem:[%s213_s30] sm:$0xf] (%p1124_p3)  ;;  %v231_v1 = vld [vmem:[%s213_s30 + $0x8] sm:$0xf] (%p1124_p3) }
  0x12   : > { %230 = vst [vmem:[%s209_s5] sm:$0xf] (%p1124_p3), %v229_v0  ;;  %232 = vst [vmem:[%s209_s5 + $0x4] sm:$0xf] (%p1124_p3), %v231_v1 }
  0x15 PF: > { %259 = sbr.rel (!%p1124_p3) target bundleno = 28 (0x1c), region = 69  ;;  %s261_s6 = sand.u32 (%p1124_p3), 1, %s1049_s16  }
  0x16   : > { %s917_s7 = sshll.u32 (%p1124_p3), %s1057_s18, 4  ;;  %s885_s8 = sshll.u32 (%p1124_p3), %s261_s6, 3 }
  0x17   : > { %s776_s11 = scalar_lea.vmem (%p1124_p3), %s1196_s1, %s917_s7  ;;  %s263_s12 = scalar_lea.vmem (%p1124_p3), [#allocation5], %s885_s8 }
  0x18   : > { %v888_v2 = vld [vmem:[%s776_s11 + $0x4] sm:$0xf] (%p1124_p3)  ;;  %v889_v3 = vld [vmem:[%s776_s11 + $0xc] sm:$0xf] (%p1124_p3) }
  0x19   : > { %285 = vst [vmem:[%s263_s12] sm:$0xf] (%p1124_p3), %v888_v2  ;;  %287 = vst [vmem:[%s263_s12 + $0x4] sm:$0xf] (%p1124_p3), %v889_v3 }
  0x1c PF: > { %p890_p6 = scmp.ge.s32.totalorder %s1061_s19, 1  ;;  %p313_p7 = scmp.lt.s32.totalorder %s1061_s19, 3 }
  0x1e   : > { %p314_p8 = pnand %p890_p6, %p313_p7 }
  0x1f   : > { %s320_s13 = sand.u32 (!%p314_p8), 1, %s1045_s15   ;;  %v1063_v4 = vmov (!%p314_p8), 0.0   ;;  %vm1064_vm0 = vmmov (!%p314_p8), 0   ;;  %s1065_s23 = smov (!%p314_p8), 127   ;;  %v1015_v7 = vld [vmem:[%s1197_s2] sm:$0xff] (!%p314_p8)   ;;  %vm421_vm1 = vcmask (!%p314_p8), 130048  }
  0x20   : > { %317 = sbr.rel (%p314_p8) target bundleno = 705 (0x2c1), region = 110  ;;  %s891_s14 = sshll.u32 (!%p314_p8), %s320_s13, 3  ;;  %934 = vmatprep.subr.bf16.mxu1 (!%p314_p8), %v1063_v4  ;;  %936 = vmatprep.mubr.msk.bf16.mxu1 (!%p314_p8), %vm1064_vm0, %v1063_v4  ;;  %vm486_vm2 = vcmask (!%p314_p8), 1039360   ;;  %vm555_vm3 = vcmask (!%p314_p8), 982016   ;;  %v1016_v14 = vld [vmem:[%s1197_s2 + $0x8] sm:$0xff] (!%p314_p8)   ;;  %v1017_v15 = vld [vmem:[%s1197_s2 + $0x10] sm:$0xff] (!%p314_p8)  }
  0x21   : > { %946 = vmatprep.subr.bf16.mxu0 (!%p314_p8), %v1063_v4  ;;  %948 = vmatprep.mubr.msk.bf16.mxu0 (!%p314_p8), %vm1064_vm0, %v1063_v4  ;;  %s322_s21 = scalar_lea.vmem (!%p314_p8), [#allocation4], %s891_s14  ;;  %s329_s22 = scalar_lea.vmem (!%p314_p8), [#allocation5], %s891_s14  ;;  %vm624_vm4 = vcmask (!%p314_p8), 973824   ;;  %v1018_v19 = vld [vmem:[%s1197_s2 + $0x18] sm:$0xff] (!%p314_p8)   ;;  %v911_v25 = vld [vmem:[%s1198_s3] ss:$0 sm:$0xff] (!%p314_p8) }
  0x22   : > { %v1013_v5 = vld [vmem:[%s322_s21] sm:$0xff] (!%p314_p8)   ;;  %v1014_v6 = vld [vmem:[%s329_s22] sm:$0xff] (!%p314_p8)   ;;  %s1066_s25 = smov (!%p314_p8), 120   ;;  %s1067_s27 = smov (!%p314_p8), 119  }
  0x23   : > { %482 = vrot.lane.b32.xlu1 (!%p314_p8), %v1013_v5, %s1065_s23  ;;  %551 = vrot.lane.b32.xlu0 (!%p314_p8), %v1013_v5, %s1066_s25  ;;  %p382_p9 = scmp.lt.s32.totalorder (!%p314_p8), %s1053_s17, 1 }
  0x24   : > { %935 = vmatpush3.bf16.msra.mxu1 (!%p314_p8), %v1013_v5 }
  0x25   : > { %940 = vmatprep.subr.bf16.mxu1 (!%p314_p8), %v1063_v4 }
  0x27   : > { %484 = vrot.lane.b32.xlu1 %v1014_v6, %s1065_s23  ;;  %553 = vrot.lane.b32.xlu0 %v1014_v6, %s1066_s25  ;;  %s1208_s17 = smov (!%p382_p9, %s1053_s17), 1 }
  0x28   : > { %937 = vmatmul.mubr.msk.bf16.vlgmr.msra.gmra.mrb[0].mxu1 %vm421_vm1, %v1015_v7  ;;  %s918_s10 = sshll.u32 %s1208_s17, 3 }
  0x29   : > { %942 = vmatprep.mubr.msk.bf16.mxu1 %vm1064_vm0, %v1063_v4  ;;  %s392_s13 = scalar_lea.vmem %s1199_s4, %s918_s10 }
  0x2b   : > { %622 = vrot.lane.b32.xlu1 %v1014_v6, %s1067_s27  ;;  %620 = vrot.lane.b32.xlu0 %v1013_v5, %s1067_s27 }
  0x95   : > { %v483_v8 = vpop.permute.xlu1 %482  ;;  %v552_v9 = vpop.permute.xlu0 %551 }
  0x99   : > { %v485_v10 = vpop.permute.xlu1 %484  ;;  %v554_v11 = vpop.permute.xlu0 %553 }
  0x9a   : > { %v487_v12 = vsel %vm486_vm2, %v483_v8, %v485_v10  ;;  %v556_v13 = vsel %vm555_vm3, %v552_v9, %v554_v11 }
  0x9b   : > { %941 = vmatpush3.bf16.msra.mxu1 %v487_v12  ;;  %947 = vmatpush3.bf16.msra.mxu0 %v556_v13 }
  0x9c   : > { %952 = vmatprep.subr.bf16.mxu0 %v1063_v4 }
  0x9d   : > { %v623_v16 = vpop.permute.xlu1 %622  ;;  %v621_v17 = vpop.permute.xlu0 %620 }
  0x9e   : > { %v625_v18 = vsel %vm624_vm4, %v621_v17, %v623_v16  ;;  %943 = vmatmul.mubr.msk.bf16.vlgmr.msra.gmra.mrb[0].mxu1 %vm421_vm1, %v1016_v14  ;;  %949 = vmatmul.mubr.msk.bf16.vlgmr.msra.gmra.mrb[0].mxu0 %vm421_vm1, %v1017_v15 }
  0x9f   : > { %953 = vmatpush3.bf16.msra.mxu0 %v625_v18  ;;  %954 = vmatprep.mubr.msk.bf16.mxu0 %vm1064_vm0, %v1063_v4 }
  0xaa   : > { %955 = vmatmul.mubr.msk.bf16.vlgmr.msra.gmra.mrb[0].mxu0 %vm421_vm1, %v1018_v19 }
 0x171   : > { %v526_v20 = vpop.f32.mrb[0].mxu1 }
 0x172   : > { %v944_v21 = vpop.f32.mrb[1].mxu1 }
 0x173   : > { %v529_v22 = vpop.f32.mrb[2].mxu1 }
 0x174   : > { %v945_v23 = vpop.f32.mrb[3].mxu1 }
 0x17d   : > { %v664_v24 = vpop.f32.mrb[0].mxu0 }
 0x17e   : > { %v958_v26 = vadd.f32 %v664_v24, %v526_v20  ;;  %v956_v27 = vpop.f32.mrb[1].mxu0 }
 0x17f   : > { %v667_v28 = vpop.f32.mrb[2].mxu0 }
 0x180   : > { %v959_v29 = vadd.f32 %v667_v28, %v529_v22  ;;  %v957_v30 = vpop.f32.mrb[3].mxu0  ;;  %v684_v31 = vmul.f32 %v958_v26, %v911_v25 }
 0x182   : > { %686 = vadd.xlane.f32.xlu0 %v684_v31  ;;  %v685_v32 = vmul.f32 %v959_v29, %v911_v25 }
 0x184   : > { %688 = vadd.xlane.f32.xlu1 %v685_v32 }
 0x20f   : > { %v687_v33 = vpop.xlane.xlu0 %686 }
 0x210   : > { %v690_v34 = vmul.f32 0.020408163, %v687_v33 }
 0x211   : > { %v689_v35 = vpop.xlane.xlu1 %688 }
 0x212   : > { %v692_v36 = vsub.f32 %v958_v26, %v690_v34  ;;  %v691_v37 = vmul.f32 0.020408163, %v689_v35 }
 0x214   : > { %v693_v38 = vsub.f32 %v959_v29, %v691_v37  ;;  %v694_v39 = vmul.f32 %v911_v25, %v692_v36 }
 0x216   : > { %v696_v40 = vmul.f32 %v694_v39, %v694_v39  ;;  %v695_v41 = vmul.f32 %v911_v25, %v693_v38 }
 0x218   : > { %698 = vadd.xlane.f32.xlu0 %v696_v40  ;;  %v697_v42 = vmul.f32 %v695_v41, %v695_v41 }
 0x21c   : > { %700 = vadd.xlane.f32.xlu0 %v697_v42 }
 0x2a5   : > { %v699_v43 = vpop.xlane.xlu0 %698 }
 0x2a6   : > { %v702_v44 = vmul.f32 0.020408163, %v699_v43 }
 0x2a8   : > { %v704_v45 = vadd.f32 1e-05, %v702_v44 }
 0x2a9   : > { %v701_v46 = vpop.xlane.xlu0 %700 }
 0x2aa   : > { %1019 = vrsqrt.f32 %v704_v45  ;;  %v703_v47 = vmul.f32 0.020408163, %v701_v46 }
 0x2ac   : > { %v705_v48 = vadd.f32 1e-05, %v703_v47 }
 0x2ae   : > { %1021 = vrsqrt.f32 %v705_v48 }
 0x2b4   : > { %v1020_v49 = vpop.eup %1019 }
 0x2b5   : > { %v708_v50 = vmul.f32 %v1020_v49, %v692_v36 }
 0x2b7   : > { %v712_v52 = vmul.f32 0.2, %v708_v50  ;;  %vm710_vm5 = vcmp.ge.f32.partialorder %v708_v50, 0.0 }
 0x2b8   : > { %v1022_v51 = vpop.eup %1021 }
 0x2b9   : > { %v709_v53 = vmul.f32 %v1022_v51, %v693_v38  ;;  %v714_v55 = vsel %vm710_vm5, %v708_v50, %v712_v52 }
 0x2bb   : > { %vm711_vm6 = vcmp.ge.f32.partialorder %v709_v53, 0.0  ;;  %v713_v54 = vmul.f32 0.2, %v709_v53 }
 0x2bd   : > { %v715_v56 = vsel %vm711_vm6, %v709_v53, %v713_v54 }
 0x2be   : > { %v924_v57 = vpack.c.bf16 %v715_v56, %v714_v55 }
 0x2c0   : > { %925 = vst [vmem:[%s392_s13] sm:$0xff] %v924_v57  }
 0x2c1 PF: > { %s14_s19 = sadd.s32 1, %s1061_s19   ;;  %s1201_s15 = smov %s1049_s16 }
 0x2c2   : > { %p11_p10 = scmp.ge.s32.totalorder %s14_s19, 4   ;;  %s1202_s16 = smov %s1132_s24 }
 0x2c3   : > { %s1203_s17 = smov %s1057_s18  ;;  %s1204_s18 = smov %s1206_s20 }
 0x2c4   :  { %13 = sbr.rel (!%p11_p10) target bundleno = 3 (0x3), region = 170 }

</bundles_post_ra>
